<compile_context>
chip_gen: v5e
topology: v5e:2x2
jax: 0.10.0
libtpu: 0.0.40
codegen_flags: <defaults>
</compile_context>

<pallas_src>
import math
import jax
import jax.numpy as jnp
from jax import lax
from jax.experimental import pallas as pl
from jax.experimental.pallas import tpu as pltpu

NEG_BIG = -1e30  # effectively -inf for padded vocab columns, without inf-inf NaNs


def _round_up(a, b):
    return ((a + b - 1) // b) * b


def _hw_defaults():
    """Per-generation tile / VMEM-limit defaults (perf review items 1,4,5,6)."""
    vmem_phys = 64 * 1024 * 1024  # conservative fallback (v7x per-TC VMEM)
    try:
        vmem_phys = pltpu.get_tpu_info().vmem_capacity_bytes
    except Exception:
        pass
    if vmem_phys >= 128 * 1024 * 1024:
        # v5e / v6e: 128 MiB physical VMEM, 1 TensorCore -> big tiles.
        return dict(tm=1024, tn=2048, tk=512, vmem_limit=96 * 1024 * 1024)
    # v7x-class: 64 MiB physical VMEM, 2 TensorCores -> smaller tiles, tighter cap.
    return dict(tm=512, tn=1024, tk=512, vmem_limit=44 * 1024 * 1024)


def _logits_lse_kernel(x_ref, w_ref, b_ref, logits_ref, lse_ref,
                       acc_sc, m_sc, l_sc):
    """Pass 1: store logits tile + online logsumexp; K-tiled NT matmul.

    Grid = (row tiles i, vocab tiles j, hidden tiles k), k innermost.
      x_ref     : (tm, tk) compute dtype
      w_ref     : (tn, tk) compute dtype   (nn.Linear (V, H) layout tile)
      b_ref     : (1, tn)  f32
      logits_ref: (tm, tn) staging tile    (written at k == last)
      lse_ref   : (tm, 1)  f32 logsumexp   (written at j == last, k == last)
      acc_sc    : (tm, tn) f32 matmul accumulator
      m_sc,l_sc : (tm, 1)  f32 running max / running sum-exp
    """
    j = pl.program_id(1)
    k = pl.program_id(2)
    nv = pl.num_programs(1)
    nk = pl.num_programs(2)

    @pl.when(jnp.logical_and(j == 0, k == 0))
    def _():
        m_sc[...] = jnp.full_like(m_sc, NEG_BIG)
        l_sc[...] = jnp.zeros_like(l_sc)

    @pl.when(k == 0)
    def _():
        acc_sc[...] = jnp.zeros_like(acc_sc)

    acc_sc[...] += lax.dot_general(
        x_ref[...], w_ref[...],
        dimension_numbers=(((1,), (1,)), ((), ())),   # contract on H (NT matmul)
        preferred_element_type=jnp.float32)

    @pl.when(k == nk - 1)
    def _():
        logits = acc_sc[...] + b_ref[...]
        logits_ref[...] = logits.astype(logits_ref.dtype)
        m_prev = m_sc[...]
        m_new = jnp.maximum(m_prev, jnp.max(logits, axis=-1, keepdims=True))
        l_sc[...] = (jnp.exp(m_prev - m_new) * l_sc[...]
                     + jnp.sum(jnp.exp(logits - m_new), axis=-1, keepdims=True))
        m_sc[...] = m_new

    @pl.when(jnp.logical_and(j == nv - 1, k == nk - 1))
    def _():
        lse_ref[...] = m_sc[...] + jnp.log(l_sc[...])


def _sub_lse_kernel(logits_ref, lse_ref, o_ref):
    """Pass 2: elementwise log-probs = logits - lse (no matmul, mem-bound)."""
    o_ref[...] = (logits_ref[...].astype(jnp.float32)
                  - lse_ref[...]).astype(o_ref.dtype)


def masked_language_model(x, weight, bias, *, tm=None, tn=None, tk=None,
                          compute_dtype=jnp.bfloat16, out_dtype=None,
                          vmem_limit_bytes=None):
    """x: (B, S, H); weight: (V, H) as in nn.Linear; bias: (V,).

    Returns log-probabilities (B, S, V) == LogSoftmax(Linear(x)).
    out_dtype defaults to x.dtype (module semantics); pass bf16 to halve the
    dominant (B*S, V) output write when the consumer (NLL loss) tolerates it.
    NOTE: for repeated calls, cast `weight` to `compute_dtype` once outside;
    the kernel never materializes a transposed copy in either case.
    """
    B, S, H = x.shape
    V = weight.shape[0]
    M = B * S
    out_dtype = x.dtype if out_dtype is None else out_dtype

    cfg = _hw_defaults()
    tm = cfg["tm"] if tm is None else tm
    tn = cfg["tn"] if tn is None else tn
    tk = cfg["tk"] if tk is None else tk
    vmem_limit = cfg["vmem_limit"] if vmem_limit_bytes is None else vmem_limit_bytes

    # Clamp tiles to the (aligned) problem size, then pad ragged edges.
    tm = min(tm, _round_up(M, 8))
    if M >= 512 and _round_up(M, tm) // tm < 2:
        # v7x megacore: pass 1 only shards the row axis -> keep >= 2 row tiles.
        tm = _round_up((M + 1) // 2, 8)
    tn = min(tn, _round_up(V, 128))
    if H <= tk:
        tk = H                                   # single K tile, no H padding
    m_pad = _round_up(M, tm)
    v_pad = _round_up(V, tn)
    k_pad = _round_up(H, tk)

    x2d = x.reshape(M, H).astype(compute_dtype)
    w = weight.astype(compute_dtype)             # stays (V, H): no HBM transpose
    b2d = bias.astype(jnp.float32).reshape(1, V)
    if m_pad != M or k_pad != H:
        x2d = jnp.pad(x2d, ((0, m_pad - M), (0, k_pad - H)))
    if v_pad != V or k_pad != H:
        w = jnp.pad(w, ((0, v_pad - V), (0, k_pad - H)))
    if v_pad != V:
        b2d = jnp.pad(b2d, ((0, 0), (0, v_pad - V)), constant_values=NEG_BIG)

    grid1 = (m_pad // tm, v_pad // tn, k_pad // tk)

    x_spec = pl.BlockSpec((tm, tk), lambda i, j, k: (i, k))
    w_spec = pl.BlockSpec((tn, tk), lambda i, j, k: (j, k))
    b_spec = pl.BlockSpec((1, tn), lambda i, j, k: (0, j))
    logits_spec = pl.BlockSpec((tm, tn), lambda i, j, k: (i, j))
    lse_spec = pl.BlockSpec((tm, 1), lambda i, j, k: (i, 0))

    # Pass 1: matmul + logits store + per-row logsumexp. Reduction axes (vocab,
    # hidden) last and "arbitrary"; row axis "parallel" for megacore sharding.
    logits, lse = pl.pallas_call(
        _logits_lse_kernel,
        out_shape=(jax.ShapeDtypeStruct((m_pad, v_pad), compute_dtype),
                   jax.ShapeDtypeStruct((m_pad, 1), jnp.float32)),
        grid_spec=pltpu.PrefetchScalarGridSpec(
            num_scalar_prefetch=0,
            grid=grid1,
            in_specs=[x_spec, w_spec, b_spec],
            out_specs=[logits_spec, lse_spec],
            scratch_shapes=[pltpu.VMEM((tm, tn), jnp.float32),
                            pltpu.VMEM((tm, 1), jnp.float32),
                            pltpu.VMEM((tm, 1), jnp.float32)]),
        compiler_params=pltpu.CompilerParams(
            dimension_semantics=("parallel", "arbitrary", "arbitrary"),
            vmem_limit_bytes=vmem_limit),
    )(x2d, w, b2d)

    # Pass 2: fully parallel, lane-dense elementwise logits - lse.
    grid2 = (m_pad // tm, v_pad // tn)
    out = pl.pallas_call(
        _sub_lse_kernel,
        out_shape=jax.ShapeDtypeStruct((m_pad, v_pad), out_dtype),
        grid_spec=pltpu.PrefetchScalarGridSpec(
            num_scalar_prefetch=0,
            grid=grid2,
            in_specs=[pl.BlockSpec((tm, tn), lambda i, j: (i, j)),
                      pl.BlockSpec((tm, 1), lambda i, j: (i, 0))],
            out_specs=pl.BlockSpec((tm, tn), lambda i, j: (i, j))),
        compiler_params=pltpu.CompilerParams(
            dimension_semantics=("parallel", "parallel"),
            vmem_limit_bytes=vmem_limit),
    )(logits, lse)

    return out[:M, :V].reshape(B, S, V)


def init_params(key, hidden, vocab_size):
    """Deterministic init matching the PyTorch module.

    weight: (vocab_size, hidden) xavier_uniform_
    bias  : (vocab_size,) nn.Linear default uniform(-1/sqrt(H), 1/sqrt(H))
    """
    kw, kb = jax.random.split(key)
    bound_w = math.sqrt(6.0 / (hidden + vocab_size))
    weight = jax.random.uniform(kw, (vocab_size, hidden), jnp.float32,
                                minval=-bound_w, maxval=bound_w)
    bound_b = 1.0 / math.sqrt(hidden)
    bias = jax.random.uniform(kb, (vocab_size,), jnp.float32,
                              minval=-bound_b, maxval=bound_b)
    return weight, bias


if __name__ == "__main__":
    # Small shapes consistent with the module's forward: (batch, seq, hidden).
    B, S, H, V = 2, 8, 32, 128

    key = jax.random.PRNGKey(0)
    kx, kp = jax.random.split(key)
    x = jax.random.normal(kx, (B, S, H), jnp.float32)
    weight, bias = init_params(kp, H, V)

    y = masked_language_model(x, weight, bias)
    y = jax.block_until_ready(y)
    assert y.shape == (B, S, V)
    assert y.dtype == x.dtype

    # Reference with the same bf16-matmul / f32-accumulate numerics.
    logits_ref = jnp.dot(x.reshape(-1, H).astype(jnp.bfloat16),
                         weight.T.astype(jnp.bfloat16),
                         preferred_element_type=jnp.float32) + bias
    ref_bf16 = jax.nn.log_softmax(logits_ref, axis=-1).reshape(B, S, V)
    err = jnp.max(jnp.abs(y.astype(jnp.float32) - ref_bf16))
    assert err < 2e-2, err

    # And stay close to the pure-f32 PyTorch semantics.
    ref_f32 = jax.nn.log_softmax(x @ weight.T + bias, axis=-1)
    err_f32 = jnp.max(jnp.abs(y.astype(jnp.float32) - ref_f32))
    assert err_f32 < 5e-2, err_f32

    # Ragged M/V/H with forced small tiles: exercises all three grid axes,
    # vocab/hidden padding and the online-logsumexp accumulation.
    B2, S2, H2, V2 = 2, 20, 200, 1000
    kx2, kp2 = jax.random.split(jax.random.PRNGKey(1))
    x2 = jax.random.normal(kx2, (B2, S2, H2), jnp.float32)
    w2, b2 = init_params(kp2, H2, V2)
    y2 = jax.block_until_ready(
        masked_language_model(x2, w2, b2, tm=16, tn=256, tk=128))
    ref2 = jax.nn.log_softmax(x2 @ w2.T + b2, axis=-1)
    err2 = jnp.max(jnp.abs(y2.astype(jnp.float32) - ref2))
    assert err2 < 5e-2, err2

    print("KERNEL_OK")
</pallas_src>

<mosaic_0001>
module attributes {stable_mosaic.version = 11 : i64} {
  func.func @_logits_lse_kernel(%arg0: i32, %arg1: i32, %arg2: i32, %arg3: memref<16x32xbf16, #tpu.memory_space<vmem>>, %arg4: memref<128x32xbf16, #tpu.memory_space<vmem>>, %arg5: memref<1x128xf32, #tpu.memory_space<vmem>>, %arg6: memref<16x128xbf16, #tpu.memory_space<vmem>>, %arg7: memref<16x1xf32, #tpu.memory_space<vmem>>, %arg8: memref<16x128xf32, #tpu.memory_space<vmem>>, %arg9: memref<16x1xf32, #tpu.memory_space<vmem>>, %arg10: memref<16x1xf32, #tpu.memory_space<vmem>>) attributes {dimension_semantics = [#tpu.dimension_semantics<parallel>, #tpu.dimension_semantics<arbitrary>, #tpu.dimension_semantics<arbitrary>], iteration_bounds = array<i64: 1, 1, 1>, scalar_prefetch = 0 : i64, scratch_operands = 3 : i64, tpu.core_type = #tpu.core_type<tc>, window_params = [{transform_indices = @transform_0, window_bounds = array<i64: 16, 32>}, {transform_indices = @transform_1, window_bounds = array<i64: 128, 32>}, {transform_indices = @transform_2, window_bounds = array<i64: 1, 128>}, {transform_indices = @transform_3, window_bounds = array<i64: 16, 128>}, {transform_indices = @transform_4, window_bounds = array<i64: 16, 1>}]} {
    %c0_i32 = arith.constant 0 : i32
    %0 = arith.cmpi eq, %arg1, %c0_i32 : i32
    %c0_i32_0 = arith.constant 0 : i32
    %1 = arith.cmpi eq, %arg2, %c0_i32_0 : i32
    %2 = arith.andi %0, %1 : i1
    %3 = arith.extui %2 : i1 to i32
    %c0_i32_1 = arith.constant 0 : i32
    %4 = arith.cmpi ne, %3, %c0_i32_1 : i32
    scf.if %4 {
      %cst_16 = arith.constant -1.000000e+30 : f32
      %22 = vector.broadcast %cst_16 : f32 to vector<16x1xf32>
      %c0_17 = arith.constant 0 : index
      %c0_18 = arith.constant 0 : index
      %23 = vector.load %arg9[%c0_17, %c0_18] : memref<16x1xf32, #tpu.memory_space<vmem>>, vector<16x1xf32>
      tpu.vector_store %arg9[%c0_17, %c0_18], %22 {strides = array<i32>} : memref<16x1xf32, #tpu.memory_space<vmem>>, vector<16x1xf32>,
      %cst_19 = arith.constant 0.000000e+00 : f32
      %24 = vector.broadcast %cst_19 : f32 to vector<16x1xf32>
      %c0_20 = arith.constant 0 : index
      %c0_21 = arith.constant 0 : index
      %25 = vector.load %arg10[%c0_20, %c0_21] : memref<16x1xf32, #tpu.memory_space<vmem>>, vector<16x1xf32>
      tpu.vector_store %arg10[%c0_20, %c0_21], %24 {strides = array<i32>} : memref<16x1xf32, #tpu.memory_space<vmem>>, vector<16x1xf32>,
    } else {
    }
    %c0_i32_2 = arith.constant 0 : i32
    %5 = arith.cmpi eq, %arg2, %c0_i32_2 : i32
    %6 = arith.extui %5 : i1 to i32
    %c0_i32_3 = arith.constant 0 : i32
    %7 = arith.cmpi ne, %6, %c0_i32_3 : i32
    scf.if %7 {
      %cst_16 = arith.constant 0.000000e+00 : f32
      %22 = vector.broadcast %cst_16 : f32 to vector<16x128xf32>
      %c0_17 = arith.constant 0 : index
      %c0_18 = arith.constant 0 : index
      %23 = vector.load %arg8[%c0_17, %c0_18] : memref<16x128xf32, #tpu.memory_space<vmem>>, vector<16x128xf32>
      tpu.vector_store %arg8[%c0_17, %c0_18], %22 {strides = array<i32>} : memref<16x128xf32, #tpu.memory_space<vmem>>, vector<16x128xf32>,
    } else {
    }
    %c0 = arith.constant 0 : index
    %c0_4 = arith.constant 0 : index
    %8 = vector.load %arg8[%c0, %c0_4] : memref<16x128xf32, #tpu.memory_space<vmem>>, vector<16x128xf32>
    %c0_5 = arith.constant 0 : index
    %c0_6 = arith.constant 0 : index
    %9 = vector.load %arg3[%c0_5, %c0_6] : memref<16x32xbf16, #tpu.memory_space<vmem>>, vector<16x32xbf16>
    %c0_7 = arith.constant 0 : index
    %c0_8 = arith.constant 0 : index
    %10 = vector.load %arg4[%c0_7, %c0_8] : memref<128x32xbf16, #tpu.memory_space<vmem>>, vector<128x32xbf16>
    %cst = arith.constant dense<0.000000e+00> : vector<16x128xf32>
    %11 = tpu.matmul %9, %10, %cst {dimension_numbers = #tpu.dot_dimension_numbers<[1], [1], [0], [0], [0, 0, 1, 0], [], []>} : vector<16x32xbf16>, vector<128x32xbf16>, vector<16x128xf32> -> vector<16x128xf32>
    %12 = arith.addf %8, %11 : vector<16x128xf32>
    %c0_9 = arith.constant 0 : index
    %c0_10 = arith.constant 0 : index
    %13 = vector.load %arg8[%c0_9, %c0_10] : memref<16x128xf32, #tpu.memory_space<vmem>>, vector<16x128xf32>
    tpu.vector_store %arg8[%c0_9, %c0_10], %12 {strides = array<i32>} : memref<16x128xf32, #tpu.memory_space<vmem>>, vector<16x128xf32>,
    %c0_i32_11 = arith.constant 0 : i32
    %14 = arith.cmpi eq, %arg2, %c0_i32_11 : i32
    %15 = arith.extui %14 : i1 to i32
    %c0_i32_12 = arith.constant 0 : i32
    %16 = arith.cmpi ne, %15, %c0_i32_12 : i32
    scf.if %16 {
      %c0_16 = arith.constant 0 : index
      %c0_17 = arith.constant 0 : index
      %22 = vector.load %arg8[%c0_16, %c0_17] : memref<16x128xf32, #tpu.memory_space<vmem>>, vector<16x128xf32>
      %c0_18 = arith.constant 0 : index
      %c0_19 = arith.constant 0 : index
      %23 = vector.load %arg5[%c0_18, %c0_19] : memref<1x128xf32, #tpu.memory_space<vmem>>, vector<1x128xf32>
      %24 = vector.broadcast %23 : vector<1x128xf32> to vector<16x128xf32>
      %25 = arith.addf %22, %24 : vector<16x128xf32>
      %26 = arith.truncf %25 : vector<16x128xf32> to vector<16x128xbf16>
      %c0_20 = arith.constant 0 : index
      %c0_21 = arith.constant 0 : index
      %27 = vector.load %arg6[%c0_20, %c0_21] : memref<16x128xbf16, #tpu.memory_space<vmem>>, vector<16x128xbf16>
      tpu.vector_store %arg6[%c0_20, %c0_21], %26 {strides = array<i32>} : memref<16x128xbf16, #tpu.memory_space<vmem>>, vector<16x128xbf16>,
      %c0_22 = arith.constant 0 : index
      %c0_23 = arith.constant 0 : index
      %28 = vector.load %arg9[%c0_22, %c0_23] : memref<16x1xf32, #tpu.memory_space<vmem>>, vector<16x1xf32>
      %cst_24 = arith.constant dense<0xFF800000> : vector<16xf32>
      %29 = vector.multi_reduction <maximumf>, %25, %cst_24 [1] : vector<16x128xf32> to vector<16xf32>
      %30 = vector.shape_cast %29 : vector<16xf32> to vector<16x1xf32>
      %31 = arith.maximumf %28, %30 : vector<16x1xf32>
      %32 = arith.subf %28, %31 : vector<16x1xf32>
      %33 = math.exp %32 : vector<16x1xf32>
      %c0_25 = arith.constant 0 : index
      %c0_26 = arith.constant 0 : index
      %34 = vector.load %arg10[%c0_25, %c0_26] : memref<16x1xf32, #tpu.memory_space<vmem>>, vector<16x1xf32>
      %35 = arith.mulf %33, %34 : vector<16x1xf32>
      %36 = vector.broadcast %31 : vector<16x1xf32> to vector<16x128xf32>
      %37 = arith.subf %25, %36 : vector<16x128xf32>
      %38 = math.exp %37 : vector<16x128xf32>
      %cst_27 = arith.constant dense<0.000000e+00> : vector<16xf32>
      %39 = vector.multi_reduction <add>, %38, %cst_27 [1] : vector<16x128xf32> to vector<16xf32>
      %40 = vector.shape_cast %39 : vector<16xf32> to vector<16x1xf32>
      %41 = arith.addf %35, %40 : vector<16x1xf32>
      %c0_28 = arith.constant 0 : index
      %c0_29 = arith.constant 0 : index
      %42 = vector.load %arg10[%c0_28, %c0_29] : memref<16x1xf32, #tpu.memory_space<vmem>>, vector<16x1xf32>
      tpu.vector_store %arg10[%c0_28, %c0_29], %41 {strides = array<i32>} : memref<16x1xf32, #tpu.memory_space<vmem>>, vector<16x1xf32>,
      %c0_30 = arith.constant 0 : index
      %c0_31 = arith.constant 0 : index
      %43 = vector.load %arg9[%c0_30, %c0_31] : memref<16x1xf32, #tpu.memory_space<vmem>>, vector<16x1xf32>
      tpu.vector_store %arg9[%c0_30, %c0_31], %31 {strides = array<i32>} : memref<16x1xf32, #tpu.memory_space<vmem>>, vector<16x1xf32>,
    } else {
    }
    %c0_i32_13 = arith.constant 0 : i32
    %17 = arith.cmpi eq, %arg1, %c0_i32_13 : i32
    %c0_i32_14 = arith.constant 0 : i32
    %18 = arith.cmpi eq, %arg2, %c0_i32_14 : i32
    %19 = arith.andi %17, %18 : i1
    %20 = arith.extui %19 : i1 to i32
    %c0_i32_15 = arith.constant 0 : i32
    %21 = arith.cmpi ne, %20, %c0_i32_15 : i32
    scf.if %21 {
      %c0_16 = arith.constant 0 : index
      %c0_17 = arith.constant 0 : index
      %22 = vector.load %arg9[%c0_16, %c0_17] : memref<16x1xf32, #tpu.memory_space<vmem>>, vector<16x1xf32>
      %c0_18 = arith.constant 0 : index
      %c0_19 = arith.constant 0 : index
      %23 = vector.load %arg10[%c0_18, %c0_19] : memref<16x1xf32, #tpu.memory_space<vmem>>, vector<16x1xf32>
      %24 = math.log %23 : vector<16x1xf32>
      %25 = arith.addf %22, %24 : vector<16x1xf32>
      %c0_20 = arith.constant 0 : index
      %c0_21 = arith.constant 0 : index
      %26 = vector.load %arg7[%c0_20, %c0_21] : memref<16x1xf32, #tpu.memory_space<vmem>>, vector<16x1xf32>
      tpu.vector_store %arg7[%c0_20, %c0_21], %25 {strides = array<i32>} : memref<16x1xf32, #tpu.memory_space<vmem>>, vector<16x1xf32>,
    } else {
    }
    return
  }
  func.func @transform_0(%arg0: i32, %arg1: i32, %arg2: i32) -> (i32, i32) {
    %c0_i32 = arith.constant 0 : i32
    return %arg0, %arg2 : i32, i32
  }
  func.func @transform_1(%arg0: i32, %arg1: i32, %arg2: i32) -> (i32, i32) {
    %c0_i32 = arith.constant 0 : i32
    return %arg1, %arg2 : i32, i32
  }
  func.func @transform_2(%arg0: i32, %arg1: i32, %arg2: i32) -> (i32, i32) {
    %c0_i32 = arith.constant 0 : i32
    %c0_i32_0 = arith.constant 0 : i32
    return %c0_i32, %arg1 : i32, i32
  }
  func.func @transform_3(%arg0: i32, %arg1: i32, %arg2: i32) -> (i32, i32) {
    %c0_i32 = arith.constant 0 : i32
    return %arg0, %arg1 : i32, i32
  }
  func.func @transform_4(%arg0: i32, %arg1: i32, %arg2: i32) -> (i32, i32) {
    %c0_i32 = arith.constant 0 : i32
    %c0_i32_0 = arith.constant 0 : i32
    return %arg0, %c0_i32 : i32, i32
  }
}

</mosaic_0001>

<bundles_post_ra>
// kernel: tpu_custom_call.1
= control target key start
LH: loop header
LB: loop body
LE: loop exit
PB: predicated region body
PF: predicated region fallthrough
CT: control target
= control target key end

     0   :  { %vm98_vm0 = vcmask 261120   ;;  %s428_s0 = inlined_call_operand.vmem [shape: bf16[16,32], index: 0, kind: input, shape index: {}]   ;;  %s429_s1 = inlined_call_operand.vmem [shape: bf16[128,32], index: 1, kind: input, shape index: {}]   ;;  %s430_s2 = inlined_call_operand.vmem [shape: f32[1,128], index: 2, kind: input, shape index: {}]   ;;  %s431_s3 = inlined_call_operand.hbm [shape: bf16[16,128], index: 3, kind: output, shape index: {0}]   ;;  %s432_s4 = inlined_call_operand.vmem [shape: f32[16,1], index: 4, kind: output, shape index: {1}]  }
   0x1   :  { %v286_v0 = vld [vmem:[%s429_s1 + $0x38] sm:$0xff] }
   0x2   :  { %v124_v1 = vsel %vm98_vm0, %v286_v0, 0 }
   0x3   :  { %10 = vsyncpa [#allocation6], 0  ;;  %126 = vmatpush.bf16.xpose.msra.mxu0 %v124_v1  ;;  %v285_v2 = vld [vmem:[%s429_s1 + $0x30] sm:$0xff]  ;;  %v284_v4 = vld [vmem:[%s429_s1 + $0x28] sm:$0xff]  ;;  %vm23_vm1 = vcmask 7168   ;;  %v340_v24 = vmov 0  }
   0x4   :  { %v121_v3 = vsel %vm98_vm0, %v285_v2, 0  ;;  %v118_v5 = vsel %vm98_vm0, %v284_v4, 0  ;;  %v283_v6 = vld [vmem:[%s429_s1 + $0x20] sm:$0xff]  ;;  %v282_v8 = vld [vmem:[%s429_s1 + $0x18] sm:$0xff]  ;;  %v281_v10 = vld [vmem:[%s429_s1 + $0x10] sm:$0xff]  ;;  %298 = vset.pattern.permute.xlu1 %v340_v24  ;;  %299 = vset.pattern.permute.xlu0 %v340_v24  ;;  %v341_v25 = vmov 0.0  }
   0x5   :  { %v115_v7 = vsel %vm98_vm0, %v283_v6, 0  ;;  %v112_v9 = vsel %vm98_vm0, %v282_v8, 0  ;;  %v109_v11 = vsel %vm98_vm0, %v281_v10, 0  ;;  %v280_v12 = vld [vmem:[%s429_s1 + $0x8] sm:$0xff]  ;;  %v279_v14 = vld [vmem:[%s429_s1] sm:$0xff]  ;;  %26 = vst.msk [vmem:[#allocation4] sm:$0xff] %vm23_vm1, %v341_v25 }
   0x6   :  { %v106_v13 = vsel %vm98_vm0, %v280_v12, 0  ;;  %v103_v15 = vsel %vm98_vm0, %v279_v14, 0  ;;  %v278_v16 = vld [vmem:[%s428_s0] sm:$0xff]  ;;  %v339_v23 = vmov -1e+30   ;;  %27 = vst.msk [vmem:[#allocation4 + $0x8] sm:$0xff] %vm23_vm1, %v341_v25 }
   0x7   :  { %v300_v17 = vld [vmem:[%s430_s2] ss:$0 sm:$0xff]  ;;  %24 = vst.msk [vmem:[#allocation3] sm:$0xff] %vm23_vm1, %v339_v23  ;;  %s342_s0 = smov [#allocation5]   ;;  %s225_s10 = sshll.u32 %s431_s3, 4  ;;  %s226_s10 = int_to_ptr.hbm [resolvable:$true] %s225_s10 }
   0x8   :  { %25 = vst.msk [vmem:[#allocation3 + $0x8] sm:$0xff] %vm23_vm1, %v339_v23  ;;  %s223_s1 = sshll.u32 %s342_s0, 4  ;;  %s343_s11 = smov 64   ;;  %s224_s1 = int_to_ptr.vmem [resolvable:$true] %s223_s1 }
   0x9   :  { %s344_s12 = smov 4  }
   0xb   :  { %127 = vmatpush.bf16.xpose.msra.mxu0 %v121_v3 }
   0xc   :  { %v173_v45 = vld [vmem:[#allocation4] sm:$0xff] }
   0xd   :  { %v174_v50 = vld [vmem:[#allocation4 + $0x8] sm:$0xff] }
   0xe   :  { %v159_v26 = vld [vmem:[#allocation3] sm:$0xff] }
   0xf   :  { %v160_v30 = vld [vmem:[#allocation3 + $0x8] sm:$0xff] }
  0x13   :  { %128 = vmatpush.bf16.xpose.msra.mxu0 %v118_v5 }
  0x1b   :  { %129 = vmatpush.bf16.xpose.msra.mxu0 %v115_v7 }
  0x23   :  { %130 = vmatpush.bf16.xpose.msra.mxu0 %v112_v9 }
  0x2b   :  { %131 = vmatpush.bf16.xpose.msra.mxu0 %v109_v11 }
  0x33   :  { %132 = vmatpush.bf16.xpose.msra.mxu0 %v106_v13 }
  0x3b   :  { %133 = vmatpush.bf16.xpose.msra.mxu0 %v103_v15 }
  0x42   :  { %277 = vmatmul.msk.bf16.vlgmr.msra.gmra.mxu0 %vm98_vm0, %v278_v16 }
  0xbf   :  { %v135_v18 = vpop.f32.mrf.mxu0 }
  0xc0   :  { %v153_v19 = vadd.f32 %v300_v17, %v135_v18 }
  0xc2   :  { %161 = vmax.xlane.f32.xlu0 %v153_v19 }
  0xc7   :  { %v137_v20 = vpop.f32.mrf.mxu0 }
  0xc8   :  { %v154_v21 = vadd.f32 %v300_v17, %v137_v20 }
  0xca   :  { %v290_v22 = vpack.c.bf16 %v154_v21, %v153_v19  ;;  %163 = vmax.xlane.f32.xlu0 %v154_v21 }
  0xcc   :  { %291 = vst [vmem:[#allocation5] sm:$0xff] %v290_v22  }
  0xcd   :  { %231 = dma.vmem_to_hbm [thread:$0]  %s224_s1, 128, %s226_s10, [#allocation6], %s343_s11, %s343_s11, %s344_s12  }
 0x135   :  { %v162_v27 = vpop.xlane.xlu0 %161 }
 0x136   :  { %v165_v28 = vmax.f32 %v159_v26, %v162_v27 }
 0x138   :  { %v167_v29 = vsub.f32 %v159_v26, %v165_v28  ;;  %202 = vst.msk [vmem:[#allocation3] sm:$0xff] %vm23_vm1, %v165_v28  ;;  %179 = vperm.xlu1 %298, %v165_v28  }
 0x13a   :  { %v169_v42 = vmul.f32 1.442695, %v167_v29 }
 0x13d   :  { %v164_v31 = vpop.xlane.xlu0 %163 }
 0x13e   :  { %v166_v32 = vmax.f32 %v160_v30, %v164_v31 }
 0x13f   :  { %v206_v58 = vld [vmem:[#allocation3] sm:$0xff] }
 0x140   :  { %v168_v33 = vsub.f32 %v160_v30, %v166_v32  ;;  %203 = vst.msk [vmem:[#allocation3 + $0x8] sm:$0xff] %vm23_vm1, %v166_v32  ;;  %184 = vperm.xlu1 %298, %v166_v32  }
 0x142   :  { %v171_v43 = vmul.f32 1.442695, %v168_v33 }
 0x147   :  { %v207_v62 = vld [vmem:[#allocation3 + $0x8] sm:$0xff] }
 0x1aa   :  { %v180_v34 = vpop.permute.xlu1 %179 }
 0x1ab   :  { %v187_v35 = vsub.f32 %v153_v19, %v180_v34 }
 0x1ad   :  { %v189_v36 = vmul.f32 1.442695, %v187_v35 }
 0x1af   :  { %301 = vpow2.f32 %v189_v36 }
 0x1b2   :  { %v185_v37 = vpop.permute.xlu1 %184 }
 0x1b3   :  { %v188_v38 = vsub.f32 %v154_v21, %v185_v37 }
 0x1b5   :  { %v302_v39 = vpop.eup %301  ;;  %v191_v40 = vmul.f32 1.442695, %v188_v38 }
 0x1b6   :  { %193 = vadd.xlane.f32.xlu2 %v302_v39 }
 0x1b7   :  { %303 = vpow2.f32 %v191_v40 }
 0x1b8   :  { %305 = vpow2.f32 %v169_v42 }
 0x1b9   :  { %307 = vpow2.f32 %v171_v43 }
 0x1bd   :  { %v304_v41 = vpop.eup %303 }
 0x1be   :  { %195 = vadd.xlane.f32.xlu2 %v304_v41  ;;  %v306_v44 = vpop.eup %305 }
 0x1bf   :  { %v175_v46 = vmul.f32 %v306_v44, %v173_v45  ;;  %v308_v49 = vpop.eup %307 }
 0x1c0   :  { %v176_v51 = vmul.f32 %v308_v49, %v174_v50 }
 0x229   :  { %v194_v47 = vpop.xlane.xlu2 %193 }
 0x22a   :  { %v197_v48 = vadd.f32 %v194_v47, %v175_v46 }
 0x22c   :  { %200 = vst.msk [vmem:[#allocation4] sm:$0xff] %vm23_vm1, %v197_v48 }
 0x231   :  { %v196_v52 = vpop.xlane.xlu2 %195 }
 0x232   :  { %v198_v53 = vadd.f32 %v196_v52, %v176_v51 }
 0x233   :  { %v208_v54 = vld [vmem:[#allocation4] sm:$0xff] }
 0x234   :  { %309 = vlog2.f32 %v208_v54  ;;  %201 = vst.msk [vmem:[#allocation4 + $0x8] sm:$0xff] %vm23_vm1, %v198_v53 }
 0x23a   :  { %v310_v55 = vpop.eup %309 }
 0x23b   :  { %v211_v56 = vmul.f32 0.6931472, %v310_v55  ;;  %v209_v57 = vld [vmem:[#allocation4 + $0x8] sm:$0xff] }
 0x23c   :  { %311 = vlog2.f32 %v209_v57 }
 0x23d   :  { %v214_v59 = vadd.f32 %v211_v56, %v206_v58 }
 0x23f   :  { %217 = vst.msk [vmem:[%s432_s4] sm:$0xff] %vm23_vm1, %v214_v59 }
 0x242   :  { %v312_v60 = vpop.eup %311 }
 0x243   :  { %v213_v61 = vmul.f32 0.6931472, %v312_v60 }
 0x245   :  { %v215_v63 = vadd.f32 %v213_v61, %v207_v62 }
 0x247   :  { %218 = vst.msk [vmem:[%s432_s4 + $0x8] sm:$0xff] %vm23_vm1, %v215_v63 }
 0x248   :  { %337 = dma.done.wait [#allocation6], 128  }
 0x249   :  { %338 = vsyncadd [#allocation6], 4294967168 }
 0x24a   :  { %240 = vsyncpa [#allocation6], 1 }

</bundles_post_ra>
